<compile_context>
chip_gen: v7x
topology: tpu7x:2x2x1
jax: 0.10.0
libtpu: 0.0.40
codegen_flags: <defaults>
</compile_context>

<pallas_src>
import functools

import jax
import jax.numpy as jnp
from jax.experimental import pallas as pl
from jax.experimental.pallas import tpu as pltpu

# Logical MLP layer sizes (from nn.Sequential in My_model3)
DIMS = [132, 256, 128, 128, 64, 40]
# Padded sizes as seen by the MXU inside the kernel
P_IN = [256, 256, 128, 128, 64]      # padded K of each layer
P_OUT = [256, 128, 128, 64, 128]     # padded N of each layer


def _round_up(n, m):
    return ((n + m - 1) // m) * m


def _pick_tile(batch, tb):
    """Batch tile: multiple of 8, clipped to the batch, and chosen so the grid
    has >= 2 steps whenever the batch allows it (v7x has 2 TensorCores)."""
    tb = _round_up(max(8, min(tb, batch)), 8)
    if batch > 8 and pl.cdiv(batch, tb) < 2:
        tb = _round_up(pl.cdiv(batch, 2), 8)
    return tb


def mlp_kernel(x_ref,
               w1_ref, b1_ref, w2_ref, b2_ref, w3_ref, b3_ref,
               w4_ref, b4_ref, w5_ref, b5_ref,
               o_ref, xpad_ref):
    """Fused 4x(Linear+ReLU) + Linear for one batch tile.

    MXU operands use the weights' dtype (bf16 on the perf path); accumulation,
    bias add and ReLU stay f32 on the VPU.  ReLU and the re-cast are fused so
    only the narrow-dtype activation is materialized between layers.
    """
    cdt = w1_ref.dtype
    tb, f_in = x_ref.shape                      # (tile, 132)

    # Build the K-padded first-layer operand in VMEM (no HBM-side padding).
    # Zero only the second lane tile (aligned at 128), then overwrite [:, :132]
    # with the real features.  Done every step -> correct under megacore
    # sharding of the batch axis (each core owns its own scratch).
    pad_start = (f_in // 128) * 128             # 128
    xpad_ref[:, pad_start:] = jnp.zeros(
        (tb, xpad_ref.shape[1] - pad_start), jnp.float32)
    xpad_ref[:, :f_in] = x_ref[...]

    h = xpad_ref[...].astype(cdt)                                        # (tb, 256)
    h = jnp.maximum(
        jnp.dot(h, w1_ref[...], preferred_element_type=jnp.float32) + b1_ref[...],
        0.0).astype(cdt)                                                 # (tb, 256)
    h = jnp.maximum(
        jnp.dot(h, w2_ref[...], preferred_element_type=jnp.float32) + b2_ref[...],
        0.0).astype(cdt)                                                 # (tb, 128)
    h = jnp.maximum(
        jnp.dot(h, w3_ref[...], preferred_element_type=jnp.float32) + b3_ref[...],
        0.0).astype(cdt)                                                 # (tb, 128)
    h = jnp.maximum(
        jnp.dot(h, w4_ref[...], preferred_element_type=jnp.float32) + b4_ref[...],
        0.0).astype(cdt)                                                 # (tb, 64)
    out = jnp.dot(h, w5_ref[...], preferred_element_type=jnp.float32) + b5_ref[...]
    o_ref[...] = out[:, :o_ref.shape[1]].astype(o_ref.dtype)             # (tb, 40)


def prepare_params(params, compute_dtype=jnp.bfloat16):
    """One-time pad + cast of the 5 (W, b) pairs (W: (in, out), b: (out,) or
    (1, out)).  Call once and reuse the result for every forward call so the
    tiny pad/cast ops don't re-run per call."""
    flat = []
    for idx, (w, b) in enumerate(params):
        din, dout = DIMS[idx], DIMS[idx + 1]
        w = jnp.asarray(w, jnp.float32)
        b = jnp.asarray(b, jnp.float32).reshape(1, dout)
        assert w.shape == (din, dout)
        wp = jnp.pad(w, ((0, P_IN[idx] - din),
                         (0, P_OUT[idx] - dout))).astype(compute_dtype)
        bp = jnp.pad(b, ((0, 0), (0, P_OUT[idx] - dout)))   # bias stays f32
        flat.extend([wp, bp])
    return tuple(flat)


@functools.partial(jax.jit, static_argnames=("tb",))
def my_model3_forward(x, prepared, tb=1024):
    """x: (B, 132) float32.  prepared: output of prepare_params()."""
    B, F = x.shape
    assert F == DIMS[0]
    assert len(prepared) == 10

    tb_eff = _pick_tile(B, tb)
    grid = (pl.cdiv(B, tb_eff),)

    # Input rows are read untouched from HBM; weights/biases are tiny (<300 KB
    # total) and stay fully resident in VMEM (constant index_map).
    in_specs = [pl.BlockSpec((tb_eff, DIMS[0]), lambda i: (i, 0))]
    for idx in range(5):
        in_specs.append(pl.BlockSpec((P_IN[idx], P_OUT[idx]), lambda i: (0, 0)))
        in_specs.append(pl.BlockSpec((1, P_OUT[idx]), lambda i: (0, 0)))

    flops = 2 * B * sum(k * n for k, n in zip(P_IN, P_OUT))
    bytes_accessed = (B * DIMS[0] * 4 + B * DIMS[-1] * 4
                      + sum(int(p.size) * p.dtype.itemsize for p in prepared))

    return pl.pallas_call(
        mlp_kernel,
        out_shape=jax.ShapeDtypeStruct((B, DIMS[-1]), jnp.float32),
        grid_spec=pltpu.PrefetchScalarGridSpec(
            num_scalar_prefetch=0,
            grid=grid,
            in_specs=in_specs,
            out_specs=pl.BlockSpec((tb_eff, DIMS[-1]), lambda i: (i, 0)),
            scratch_shapes=[pltpu.VMEM((tb_eff, P_IN[0]), jnp.float32)],
        ),
        # ~4-6 MiB working set at tb=1024: under v5e's 16 MiB scoped-VMEM
        # default and far under v6e/v7x's 32 MiB.  Don't push tb past ~2048 on
        # v5e (or ~4096 elsewhere) without raising vmem_limit_bytes.
        compiler_params=pltpu.CompilerParams(
            dimension_semantics=("parallel",)),
        cost_estimate=pl.CostEstimate(
            flops=flops, transcendentals=0, bytes_accessed=bytes_accessed),
    )(x, *prepared)


def init_params(key):
    """Init matching PyTorch nn.Linear default (U[-1/sqrt(fan_in), 1/sqrt(fan_in)]),
    already in (in_features, out_features) layout."""
    params = []
    for din, dout in zip(DIMS[:-1], DIMS[1:]):
        key, kw, kb = jax.random.split(key, 3)
        bound = 1.0 / float(din) ** 0.5
        w = jax.random.uniform(kw, (din, dout), jnp.float32, -bound, bound)
        b = jax.random.uniform(kb, (1, dout), jnp.float32, -bound, bound)
        params.append((w, b))
    return params


def reference_forward(x, params, compute_dtype=jnp.float32):
    """Pure-JAX reference with the same operand-cast structure as the kernel."""
    h = x.astype(compute_dtype)
    for i, (w, b) in enumerate(params):
        h32 = jnp.dot(h, w.astype(compute_dtype),
                      preferred_element_type=jnp.float32) + b.astype(jnp.float32)
        if i < len(params) - 1:
            h32 = jnp.maximum(h32, 0.0)
            h = h32.astype(compute_dtype)
        else:
            h = h32
    return h


if __name__ == "__main__":
    key = jax.random.PRNGKey(0)
    key, kx = jax.random.split(key)

    B = 16                       # small demo batch; tile picker splits it in 2
    x = jax.random.normal(kx, (B, DIMS[0]), jnp.float32)
    params = init_params(key)

    prepared_bf16 = prepare_params(params, jnp.bfloat16)   # perf path
    prepared_f32 = prepare_params(params, jnp.float32)     # correctness-check path

    out_bf16 = my_model3_forward(x, prepared_bf16)
    jax.block_until_ready(out_bf16)
    out_f32 = my_model3_forward(x, prepared_f32)
    jax.block_until_ready(out_f32)

    ref_f32 = reference_forward(x, params, jnp.float32)
    ref_bf16 = reference_forward(x, params, jnp.bfloat16)

    assert out_f32.shape == (B, DIMS[-1])
    assert out_bf16.shape == (B, DIMS[-1])
    assert jnp.allclose(out_f32, ref_f32, atol=1e-4, rtol=1e-4), "f32 mismatch vs reference"
    assert jnp.allclose(out_bf16, ref_bf16, atol=3e-2, rtol=3e-2), "bf16 mismatch vs bf16 reference"

    print("KERNEL_OK")
</pallas_src>

<mosaic_0001>
module attributes {stable_mosaic.version = 11 : i64} {
  func.func @mlp_kernel(%arg0: i32, %arg1: memref<8x132xf32, #tpu.memory_space<vmem>>, %arg2: memref<256x256xbf16, #tpu.memory_space<vmem>>, %arg3: memref<1x256xf32, #tpu.memory_space<vmem>>, %arg4: memref<256x128xbf16, #tpu.memory_space<vmem>>, %arg5: memref<1x128xf32, #tpu.memory_space<vmem>>, %arg6: memref<128x128xbf16, #tpu.memory_space<vmem>>, %arg7: memref<1x128xf32, #tpu.memory_space<vmem>>, %arg8: memref<128x64xbf16, #tpu.memory_space<vmem>>, %arg9: memref<1x64xf32, #tpu.memory_space<vmem>>, %arg10: memref<64x128xbf16, #tpu.memory_space<vmem>>, %arg11: memref<1x128xf32, #tpu.memory_space<vmem>>, %arg12: memref<8x40xf32, #tpu.memory_space<vmem>>, %arg13: memref<8x256xf32, #tpu.memory_space<vmem>>) attributes {dimension_semantics = [#tpu.dimension_semantics<parallel>], iteration_bounds = array<i64: 2>, scalar_prefetch = 0 : i64, scratch_operands = 1 : i64, tpu.core_type = #tpu.core_type<tc>, window_params = [{transform_indices = @transform_0, window_bounds = array<i64: 8, 132>}, {pipeline_mode = #tpu.pipeline_mode<synchronous>, transform_indices = @transform_1, window_bounds = array<i64: 256, 256>}, {pipeline_mode = #tpu.pipeline_mode<synchronous>, transform_indices = @transform_2, window_bounds = array<i64: 1, 256>}, {pipeline_mode = #tpu.pipeline_mode<synchronous>, transform_indices = @transform_3, window_bounds = array<i64: 256, 128>}, {pipeline_mode = #tpu.pipeline_mode<synchronous>, transform_indices = @transform_4, window_bounds = array<i64: 1, 128>}, {pipeline_mode = #tpu.pipeline_mode<synchronous>, transform_indices = @transform_5, window_bounds = array<i64: 128, 128>}, {pipeline_mode = #tpu.pipeline_mode<synchronous>, transform_indices = @transform_6, window_bounds = array<i64: 1, 128>}, {pipeline_mode = #tpu.pipeline_mode<synchronous>, transform_indices = @transform_7, window_bounds = array<i64: 128, 64>}, {pipeline_mode = #tpu.pipeline_mode<synchronous>, transform_indices = @transform_8, window_bounds = array<i64: 1, 64>}, {pipeline_mode = #tpu.pipeline_mode<synchronous>, transform_indices = @transform_9, window_bounds = array<i64: 64, 128>}, {pipeline_mode = #tpu.pipeline_mode<synchronous>, transform_indices = @transform_10, window_bounds = array<i64: 1, 128>}, {transform_indices = @transform_11, window_bounds = array<i64: 8, 40>}]} {
    %cst = arith.constant 0.000000e+00 : f32
    %0 = vector.broadcast %cst : f32 to vector<8x128xf32>
    %c0 = arith.constant 0 : index
    %c128 = arith.constant 128 : index
    %1 = vector.load %arg13[%c0, %c128] : memref<8x256xf32, #tpu.memory_space<vmem>>, vector<8x128xf32>
    tpu.vector_store %arg13[%c0, %c128], %0 {strides = array<i32>} : memref<8x256xf32, #tpu.memory_space<vmem>>, vector<8x128xf32>,
    %c0_0 = arith.constant 0 : index
    %c0_1 = arith.constant 0 : index
    %2 = vector.load %arg1[%c0_0, %c0_1] : memref<8x132xf32, #tpu.memory_space<vmem>>, vector<8x132xf32>
    %c0_2 = arith.constant 0 : index
    %c0_3 = arith.constant 0 : index
    %3 = vector.load %arg13[%c0_2, %c0_3] : memref<8x256xf32, #tpu.memory_space<vmem>>, vector<8x132xf32>
    tpu.vector_store %arg13[%c0_2, %c0_3], %2 {strides = array<i32>} : memref<8x256xf32, #tpu.memory_space<vmem>>, vector<8x132xf32>,
    %c0_4 = arith.constant 0 : index
    %c0_5 = arith.constant 0 : index
    %4 = vector.load %arg13[%c0_4, %c0_5] : memref<8x256xf32, #tpu.memory_space<vmem>>, vector<8x256xf32>
    %5 = arith.truncf %4 : vector<8x256xf32> to vector<8x256xbf16>
    %c0_6 = arith.constant 0 : index
    %c0_7 = arith.constant 0 : index
    %6 = vector.load %arg2[%c0_6, %c0_7] : memref<256x256xbf16, #tpu.memory_space<vmem>>, vector<256x256xbf16>
    %cst_8 = arith.constant dense<0.000000e+00> : vector<8x256xf32>
    %7 = tpu.matmul %5, %6, %cst_8 {dimension_numbers = #tpu.dot_dimension_numbers<[1], [0], [0], [1], [0, 0, 1, 1], [], []>} : vector<8x256xbf16>, vector<256x256xbf16>, vector<8x256xf32> -> vector<8x256xf32>
    %c0_9 = arith.constant 0 : index
    %c0_10 = arith.constant 0 : index
    %8 = vector.load %arg3[%c0_9, %c0_10] : memref<1x256xf32, #tpu.memory_space<vmem>>, vector<1x256xf32>
    %9 = vector.broadcast %8 : vector<1x256xf32> to vector<8x256xf32>
    %10 = arith.addf %7, %9 : vector<8x256xf32>
    %cst_11 = arith.constant 0.000000e+00 : f32
    %11 = vector.broadcast %cst_11 : f32 to vector<8x256xf32>
    %12 = arith.maximumf %10, %11 : vector<8x256xf32>
    %13 = arith.truncf %12 : vector<8x256xf32> to vector<8x256xbf16>
    %c0_12 = arith.constant 0 : index
    %c0_13 = arith.constant 0 : index
    %14 = vector.load %arg4[%c0_12, %c0_13] : memref<256x128xbf16, #tpu.memory_space<vmem>>, vector<256x128xbf16>
    %cst_14 = arith.constant dense<0.000000e+00> : vector<8x128xf32>
    %15 = tpu.matmul %13, %14, %cst_14 {dimension_numbers = #tpu.dot_dimension_numbers<[1], [0], [0], [1], [0, 0, 1, 1], [], []>} : vector<8x256xbf16>, vector<256x128xbf16>, vector<8x128xf32> -> vector<8x128xf32>
    %c0_15 = arith.constant 0 : index
    %c0_16 = arith.constant 0 : index
    %16 = vector.load %arg5[%c0_15, %c0_16] : memref<1x128xf32, #tpu.memory_space<vmem>>, vector<1x128xf32>
    %17 = vector.broadcast %16 : vector<1x128xf32> to vector<8x128xf32>
    %18 = arith.addf %15, %17 : vector<8x128xf32>
    %cst_17 = arith.constant 0.000000e+00 : f32
    %19 = vector.broadcast %cst_17 : f32 to vector<8x128xf32>
    %20 = arith.maximumf %18, %19 : vector<8x128xf32>
    %21 = arith.truncf %20 : vector<8x128xf32> to vector<8x128xbf16>
    %c0_18 = arith.constant 0 : index
    %c0_19 = arith.constant 0 : index
    %22 = vector.load %arg6[%c0_18, %c0_19] : memref<128x128xbf16, #tpu.memory_space<vmem>>, vector<128x128xbf16>
    %cst_20 = arith.constant dense<0.000000e+00> : vector<8x128xf32>
    %23 = tpu.matmul %21, %22, %cst_20 {dimension_numbers = #tpu.dot_dimension_numbers<[1], [0], [0], [1], [0, 0, 1, 1], [], []>} : vector<8x128xbf16>, vector<128x128xbf16>, vector<8x128xf32> -> vector<8x128xf32>
    %c0_21 = arith.constant 0 : index
    %c0_22 = arith.constant 0 : index
    %24 = vector.load %arg7[%c0_21, %c0_22] : memref<1x128xf32, #tpu.memory_space<vmem>>, vector<1x128xf32>
    %25 = vector.broadcast %24 : vector<1x128xf32> to vector<8x128xf32>
    %26 = arith.addf %23, %25 : vector<8x128xf32>
    %cst_23 = arith.constant 0.000000e+00 : f32
    %27 = vector.broadcast %cst_23 : f32 to vector<8x128xf32>
    %28 = arith.maximumf %26, %27 : vector<8x128xf32>
    %29 = arith.truncf %28 : vector<8x128xf32> to vector<8x128xbf16>
    %c0_24 = arith.constant 0 : index
    %c0_25 = arith.constant 0 : index
    %30 = vector.load %arg8[%c0_24, %c0_25] : memref<128x64xbf16, #tpu.memory_space<vmem>>, vector<128x64xbf16>
    %cst_26 = arith.constant dense<0.000000e+00> : vector<8x64xf32>
    %31 = tpu.matmul %29, %30, %cst_26 {dimension_numbers = #tpu.dot_dimension_numbers<[1], [0], [0], [1], [0, 0, 1, 1], [], []>} : vector<8x128xbf16>, vector<128x64xbf16>, vector<8x64xf32> -> vector<8x64xf32>
    %c0_27 = arith.constant 0 : index
    %c0_28 = arith.constant 0 : index
    %32 = vector.load %arg9[%c0_27, %c0_28] : memref<1x64xf32, #tpu.memory_space<vmem>>, vector<1x64xf32>
    %33 = vector.broadcast %32 : vector<1x64xf32> to vector<8x64xf32>
    %34 = arith.addf %31, %33 : vector<8x64xf32>
    %cst_29 = arith.constant 0.000000e+00 : f32
    %35 = vector.broadcast %cst_29 : f32 to vector<8x64xf32>
    %36 = arith.maximumf %34, %35 : vector<8x64xf32>
    %37 = arith.truncf %36 : vector<8x64xf32> to vector<8x64xbf16>
    %c0_30 = arith.constant 0 : index
    %c0_31 = arith.constant 0 : index
    %38 = vector.load %arg10[%c0_30, %c0_31] : memref<64x128xbf16, #tpu.memory_space<vmem>>, vector<64x128xbf16>
    %cst_32 = arith.constant dense<0.000000e+00> : vector<8x128xf32>
    %39 = tpu.matmul %37, %38, %cst_32 {dimension_numbers = #tpu.dot_dimension_numbers<[1], [0], [0], [1], [0, 0, 1, 1], [], []>} : vector<8x64xbf16>, vector<64x128xbf16>, vector<8x128xf32> -> vector<8x128xf32>
    %c0_33 = arith.constant 0 : index
    %c0_34 = arith.constant 0 : index
    %40 = vector.load %arg11[%c0_33, %c0_34] : memref<1x128xf32, #tpu.memory_space<vmem>>, vector<1x128xf32>
    %41 = vector.broadcast %40 : vector<1x128xf32> to vector<8x128xf32>
    %42 = arith.addf %39, %41 : vector<8x128xf32>
    %43 = vector.extract_strided_slice %42 {offsets = [0, 0], sizes = [8, 40], strides = [1, 1]} : vector<8x128xf32> to vector<8x40xf32>
    %c0_35 = arith.constant 0 : index
    %c0_36 = arith.constant 0 : index
    %44 = vector.load %arg12[%c0_35, %c0_36] : memref<8x40xf32, #tpu.memory_space<vmem>>, vector<8x40xf32>
    tpu.vector_store %arg12[%c0_35, %c0_36], %43 {strides = array<i32>} : memref<8x40xf32, #tpu.memory_space<vmem>>, vector<8x40xf32>,
    return
  }
  func.func @transform_0(%arg0: i32) -> (i32, i32) {
    %c0_i32 = arith.constant 0 : i32
    %c0_i32_0 = arith.constant 0 : i32
    return %arg0, %c0_i32 : i32, i32
  }
  func.func @transform_1(%arg0: i32) -> (i32, i32) {
    %c0_i32 = arith.constant 0 : i32
    %c0_i32_0 = arith.constant 0 : i32
    %c0_i32_1 = arith.constant 0 : i32
    return %c0_i32, %c0_i32_0 : i32, i32
  }
  func.func @transform_2(%arg0: i32) -> (i32, i32) {
    %c0_i32 = arith.constant 0 : i32
    %c0_i32_0 = arith.constant 0 : i32
    %c0_i32_1 = arith.constant 0 : i32
    return %c0_i32, %c0_i32_0 : i32, i32
  }
  func.func @transform_3(%arg0: i32) -> (i32, i32) {
    %c0_i32 = arith.constant 0 : i32
    %c0_i32_0 = arith.constant 0 : i32
    %c0_i32_1 = arith.constant 0 : i32
    return %c0_i32, %c0_i32_0 : i32, i32
  }
  func.func @transform_4(%arg0: i32) -> (i32, i32) {
    %c0_i32 = arith.constant 0 : i32
    %c0_i32_0 = arith.constant 0 : i32
    %c0_i32_1 = arith.constant 0 : i32
    return %c0_i32, %c0_i32_0 : i32, i32
  }
  func.func @transform_5(%arg0: i32) -> (i32, i32) {
    %c0_i32 = arith.constant 0 : i32
    %c0_i32_0 = arith.constant 0 : i32
    %c0_i32_1 = arith.constant 0 : i32
    return %c0_i32, %c0_i32_0 : i32, i32
  }
  func.func @transform_6(%arg0: i32) -> (i32, i32) {
    %c0_i32 = arith.constant 0 : i32
    %c0_i32_0 = arith.constant 0 : i32
    %c0_i32_1 = arith.constant 0 : i32
    return %c0_i32, %c0_i32_0 : i32, i32
  }
  func.func @transform_7(%arg0: i32) -> (i32, i32) {
    %c0_i32 = arith.constant 0 : i32
    %c0_i32_0 = arith.constant 0 : i32
    %c0_i32_1 = arith.constant 0 : i32
    return %c0_i32, %c0_i32_0 : i32, i32
  }
  func.func @transform_8(%arg0: i32) -> (i32, i32) {
    %c0_i32 = arith.constant 0 : i32
    %c0_i32_0 = arith.constant 0 : i32
    %c0_i32_1 = arith.constant 0 : i32
    return %c0_i32, %c0_i32_0 : i32, i32
  }
  func.func @transform_9(%arg0: i32) -> (i32, i32) {
    %c0_i32 = arith.constant 0 : i32
    %c0_i32_0 = arith.constant 0 : i32
    %c0_i32_1 = arith.constant 0 : i32
    return %c0_i32, %c0_i32_0 : i32, i32
  }
  func.func @transform_10(%arg0: i32) -> (i32, i32) {
    %c0_i32 = arith.constant 0 : i32
    %c0_i32_0 = arith.constant 0 : i32
    %c0_i32_1 = arith.constant 0 : i32
    return %c0_i32, %c0_i32_0 : i32, i32
  }
  func.func @transform_11(%arg0: i32) -> (i32, i32) {
    %c0_i32 = arith.constant 0 : i32
    %c0_i32_0 = arith.constant 0 : i32
    return %arg0, %c0_i32 : i32, i32
  }
}

</mosaic_0001>

<bundles_post_ra>
// kernel: my_model3_forward.1
= control target key start
LH: loop header
LB: loop body
LE: loop exit
PB: predicated region body
PF: predicated region fallthrough
CT: control target
= control target key end

     0   :  { %s2321_s0 = inlined_call_operand.vmem [shape: f32[16,132], index: 0, kind: input, shape index: {}]   ;;  %s2322_s1 = inlined_call_operand.hbm [shape: bf16[256,256], index: 1, kind: input, shape index: {}]   ;;  %s2323_s2 = inlined_call_operand.vmem [shape: f32[1,256], index: 2, kind: input, shape index: {}]   ;;  %s2324_s3 = inlined_call_operand.hbm [shape: bf16[256,128], index: 3, kind: input, shape index: {}]   ;;  %s2325_s4 = inlined_call_operand.hbm [shape: f32[1,128], index: 4, kind: input, shape index: {}]   ;;  %s2326_s5 = inlined_call_operand.vmem [shape: bf16[128,128], index: 5, kind: input, shape index: {}]   ;;  %s2327_s6 = inlined_call_operand.hbm [shape: f32[1,128], index: 6, kind: input, shape index: {}]   ;;  %s2328_s7 = inlined_call_operand.vmem [shape: bf16[128,64], index: 7, kind: input, shape index: {}]   ;;  %s2329_s8 = inlined_call_operand.hbm [shape: f32[1,64], index: 8, kind: input, shape index: {}]   ;;  %s2330_s9 = inlined_call_operand.vmem [shape: bf16[64,128], index: 9, kind: input, shape index: {}]   ;;  %s2331_s10 = inlined_call_operand.vmem [shape: f32[1,128], index: 10, kind: input, shape index: {}]   ;;  %s2332_s11 = inlined_call_operand.hbm [shape: f32[16,40], index: 11, kind: output, shape index: {}]  }
   0x1   :  { %2343 = sst [smem:[#allocation23_spill]] %s2324_s3 }
   0x2   :  { %2344 = sst [smem:[#allocation24_spill]] %s2327_s6 }
   0x3   :  { %2345 = sst [smem:[#allocation25_spill]] %s2332_s11 }
   0x4   :  { %16 = vsyncpa [#allocation4], 0 }
   0x5   :  { %17 = vsyncpa [#allocation7], 0 }
   0x6   :  { %18 = vsyncpa [#allocation10], 0 }
   0x7   :  { %19 = vsyncpa [#allocation5], 0 }
   0x8   :  { %21 = vsyncpa [#allocation5 + $0x1], 0  ;;  %s1983_s17 = smov 0   ;;  %s1985_s18 = smov 0  }
   0x9   :  { %s1987_s19 = smov 0   ;;  %s1989_s20 = smov 0  }
   0xa LB: > { %2346 = sst [smem:[#allocation17_spill]] %s1897_s17  ;;  %s2004_s21 = sadd.s32 4294967295, %s1909_s20   ;;  %s1909_s20 = sphi %s1989_s20, %s2373_s20   ;;  %s1905_s19 = sphi %s1987_s19, %s2378_s19   ;;  %s1901_s18 = sphi %s1985_s18, %s2377_s18   ;;  %s1897_s17 = sphi %s1983_s17, %s2376_s17  }
   0xb   : > { %2347 = sst [smem:[#allocation18_spill]] %s1905_s19  ;;  %s1323_s22 = sadd.s32 4294967294, %s1909_s20  }
   0xc   : > { %2348 = sst [smem:[#allocation19_spill]] %s1909_s20  ;;  %s2008_s23 = sadd.s32 1, %s1909_s20  }
   0xd   : > { %2349 = sst [smem:[#allocation20_spill]] %s2008_s23  ;;  %s270_s24 = sadd.s32 1, %s1905_s19 }
   0xe   : > { %s267_s25 = ssub.s32 %s1909_s20, %s2008_s23  ;;  %p280_p0 = scmp.ne.s32.totalorder %s1905_s19, %s1901_s18 }
   0xf   : > { %p268_p1 = scmp.eq.s32.totalorder %s267_s25, 0  ;;  %p281_p2 = scmp.eq.s32.totalorder %s2004_s21, 1 }
  0x10   : > { %p286_p3 = scmp.ne.s32.totalorder %s1901_s18, %s1897_s17  ;;  %p287_p4 = scmp.eq.s32.totalorder %s1323_s22, 1 }
  0x11   : > { %s2019_s26 = scalar_select %p268_p1, %s1905_s19, %s270_s24  }
  0x12   : > { %p2021_p5 = por %p281_p2, %p280_p0  ;;  %p2025_p6 = por %p287_p4, %p286_p3 }
  0x13   : > { %2350 = sst [smem:[#allocation21_spill]] %s2019_s26  ;;  %p1324_p7 = scmp.ge.s32.totalorder %s1909_s20, 1 }
  0x14   : > { %s2351_s27 = scalar_select %p2021_p5, 1, 0 }
  0x15   : > { %s2352_s28 = scalar_select %p2025_p6, 1, 0 }
  0x16   : > { %p294_p8 = scmp.lt.s32.totalorder %s1909_s20, 3  ;;  %p2336_p9 = scmp.eq.s32.totalorder %s2004_s21, 0 }
  0x17   : > { %2353 = sst [smem:[#allocation22_spill]] %s2352_s28  ;;  %s1911_s30 = smov [#allocation6]  }
  0x18   : > { %p2032_p10 = pnand %p1324_p7, %p294_p8  ;;  %s322_s12 = sshll.u32 %s1911_s30, 4  ;;  %s2038_s12 = int_to_ptr.vmem [resolvable:$true] %s322_s12 }
  0x19   : > { %s1912_s14 = smov [#allocation9]   ;;  %s1913_s16 = smov [#allocation3]  }
  0x1a   : > { %s2354_s29 = scalar_select %p2032_p10, 1, 0 }
  0x1b   : > { %p1537_p11 = pneg %p2032_p10  ;;  %s350_s15 = sshll.u32 %s1912_s14, 4  ;;  %s2046_s15 = int_to_ptr.vmem [resolvable:$true] %s350_s15 }
  0x1c   : > { %s2048_s22 = sshll.u32 %s1913_s16, 4  ;;  %s2356_s3 = sld [smem:[#allocation23_spill]]  ;;  %s307_s22 = int_to_ptr.vmem [resolvable:$true] %s2048_s22 }
  0x1d   : > { %p2042_p12 = pnand %p2336_p9, %p1537_p11 }
  0x1f   : > { %p2058_p0 = pneg %p2042_p12 }
  0x22   : > { %s1695_s30 = scalar_lea.hbm %s2356_s3, 2048 }
  0x23   : > { %p1696_p13 = scmp.ne.s32.totalorder %s2356_s3, %s1695_s30  ;;  %p1702_p3 = scmp.lt.u32.totalorder %s1695_s30, %s2356_s3 }
  0x25   : > { %p1698_p1 = pnand %p2058_p0, %p1696_p13 }
  0x27   : > { %p1699_p2 = pneg %p1698_p1 }
  0x29   : > { %p1704_p4 = pnand %p1702_p3, %p1699_p2 }
  0x2b   : > { %1707 = shalt.err (!%p1704_p4)
}
  0x2c   : > { %s1708_s19 = scalar_lea.vmem %s2038_s12, 2048  ;;  %p1716_p9 = scmp.lt.s32.totalorder %s2038_s12, %s2038_s12 }
  0x2d   : > { %p1709_p7 = scmp.ne.s32.totalorder %s2038_s12, %s1708_s19  ;;  %p1717_p6 = scmp.lt.s32.totalorder %s1708_s19, %s1708_s19 }
  0x2f   : > { %p1711_p8 = pnand %p1709_p7, %p2058_p0  ;;  %p1718_p13 = por %p1717_p6, %p1716_p9 }
  0x31   : > { %p1712_p11 = pneg %p1711_p8 }
  0x33   : > { %p1719_p1 = pnand %p1718_p13, %p1712_p11 }
  0x35   : > { %1722 = shalt.err (!%p1719_p1)
}
  0x36   : > { %s1914_s26 = smov 64   ;;  %s1915_s24 = smov 4  }
  0x37   : > { %1543 = dma.hbm_to_vmem [thread:$0]  (!%p2042_p12), %s2356_s3, 2048, %s2038_s12, [#allocation7], %s1914_s26, %s1914_s26, %s1915_s24  }
  0x38   : > { %s2358_s6 = sld [smem:[#allocation24_spill]] }
  0x3e   : > { %s1723_s28 = scalar_lea.hbm %s2358_s6, 16 }
  0x3f   : > { %p1724_p6 = scmp.ne.s32.totalorder %s2358_s6, %s1723_s28  ;;  %p1730_p3 = scmp.lt.u32.totalorder %s1723_s28, %s2358_s6 }
  0x41   : > { %p1726_p9 = pnand %p1724_p6, %p2058_p0 }
  0x43   : > { %p1727_p2 = pneg %p1726_p9 }
  0x45   : > { %p1732_p4 = pnand %p1730_p3, %p1727_p2 }
  0x47   : > { %1735 = shalt.err (!%p1732_p4)
}
  0x48   : > { %s1736_s12 = scalar_lea.vmem %s2046_s15, 16  ;;  %s1743_s17 = scalar_lea.vmem %s2046_s15, 32 }
  0x49   : > { %p1737_p7 = scmp.ne.s32.totalorder %s2046_s15, %s1736_s12  ;;  %p1744_p13 = scmp.lt.s32.totalorder %s2046_s15, %s2046_s15 }
  0x4a   : > { %p1745_p1 = scmp.lt.s32.totalorder %s1743_s17, %s1736_s12 }
  0x4b   : > { %p1739_p8 = pnand %p1737_p7, %p2058_p0 }
  0x4c   : > { %p1746_p6 = por %p1745_p1, %p1744_p13 }
  0x4d   : > { %p1740_p11 = pneg %p1739_p8 }
  0x4f   : > { %p1747_p9 = pnand %p1746_p6, %p1740_p11 }
  0x51   : > { %1750 = shalt.err (!%p1747_p9)
}
  0x52   : > { %1549 = dma.hbm_to_vmem [thread:$0]  (!%p2042_p12), %s2358_s6, 16, %s2046_s15, [#allocation10]  }
  0x53   : > { %s1751_s24 = scalar_lea.hbm %s2322_s1, 4096 }
  0x54   : > { %p1752_p2 = scmp.ne.s32.totalorder %s2322_s1, %s1751_s24  ;;  %p1758_p7 = scmp.lt.u32.totalorder %s1751_s24, %s2322_s1 }
  0x56   : > { %p1754_p3 = pnand %p1752_p2, %p2058_p0 }
  0x58   : > { %p1755_p4 = pneg %p1754_p3 }
  0x5a   : > { %p1760_p8 = pnand %p1758_p7, %p1755_p4 }
  0x5c   : > { %1763 = shalt.err (!%p1760_p8)
}
  0x5d   : > { %s1764_s19 = scalar_lea.vmem %s307_s22, 4096  ;;  %p1772_p6 = scmp.lt.s32.totalorder %s307_s22, %s307_s22 }
  0x5e   : > { %p1765_p11 = scmp.ne.s32.totalorder %s307_s22, %s1764_s19  ;;  %p1773_p9 = scmp.lt.s32.totalorder %s1764_s19, %s1764_s19 }
  0x60   : > { %p1767_p13 = pnand %p1765_p11, %p2058_p0  ;;  %p1774_p5 = por %p1773_p9, %p1772_p6 }
  0x62   : > { %p1768_p1 = pneg %p1767_p13 }
  0x64   : > { %p1775_p10 = pnand %p1774_p5, %p1768_p1 }
  0x66   : > { %1778 = shalt.err (!%p1775_p10)
}
  0x67   : > { %s1916_s15 = smov 128   ;;  %s1917_s12 = smov 8  }
  0x68   : > { %1540 = dma.hbm_to_vmem [thread:$0]  (!%p2042_p12), %s2322_s1, 4096, %s307_s22, [#allocation4], %s1916_s15, %s1916_s15, %s1917_s12  }
  0x69   : > { %s1918_s20 = smov [#allocation8]   ;;  %s1919_s26 = smov [#allocation11]  }
  0x6a   : > { %s336_s28 = sshll.u32 %s1918_s20, 4  ;;  %s364_s24 = sshll.u32 %s1919_s26, 4  ;;  %s337_s28 = int_to_ptr.vmem [resolvable:$true] %s336_s28  ;;  %s365_s24 = int_to_ptr.vmem [resolvable:$true] %s364_s24 }
  0x6b   : > { %s1779_s14 = scalar_lea.hbm %s2325_s4, 16 }
  0x6c   : > { %p1780_p5 = scmp.ne.s32.totalorder %s2325_s4, %s1779_s14  ;;  %p1786_p3 = scmp.lt.u32.totalorder %s1779_s14, %s2325_s4 }
  0x6e   : > { %p1782_p10 = pnand %p1780_p5, %p2058_p0 }
  0x70   : > { %p1783_p2 = pneg %p1782_p10 }
  0x72   : > { %p1788_p4 = pnand %p1786_p3, %p1783_p2 }
  0x74   : > { %1791 = shalt.err (!%p1788_p4)
}
  0x75   : > { %s1792_s22 = scalar_lea.vmem %s337_s28, 16  ;;  %s1799_s15 = scalar_lea.vmem %s337_s28, 32 }
  0x76   : > { %p1793_p7 = scmp.ne.s32.totalorder %s337_s28, %s1792_s22  ;;  %p1800_p13 = scmp.lt.s32.totalorder %s337_s28, %s337_s28 }
  0x77   : > { %p1801_p1 = scmp.lt.s32.totalorder %s1799_s15, %s1792_s22 }
  0x78   : > { %p1795_p8 = pnand %p1793_p7, %p2058_p0 }
  0x79   : > { %p1802_p6 = por %p1801_p1, %p1800_p13 }
  0x7a   : > { %p1796_p11 = pneg %p1795_p8 }
  0x7c   : > { %p1803_p9 = pnand %p1802_p6, %p1796_p11 }
  0x7e   : > { %1806 = shalt.err (!%p1803_p9)
}
  0x7f   : > { %1546 = dma.hbm_to_vmem [thread:$0]  (!%p2042_p12), %s2325_s4, 16, %s337_s28, [#allocation7]  }
  0x80   : > { %s1807_s11 = scalar_lea.hbm %s2329_s8, 16 }
  0x81   : > { %p1808_p5 = scmp.ne.s32.totalorder %s2329_s8, %s1807_s11  ;;  %p1814_p3 = scmp.lt.u32.totalorder %s1807_s11, %s2329_s8 }
  0x83   : > { %p1810_p10 = pnand %p1808_p5, %p2058_p0 }
  0x85   : > { %p1811_p2 = pneg %p1810_p10 }
  0x87   : > { %p1816_p4 = pnand %p1814_p3, %p1811_p2 }
  0x89   : > { %1819 = shalt.err (!%p1816_p4)
}
  0x8a   : > { %s1820_s14 = scalar_lea.vmem %s365_s24, 16  ;;  %s1827_s28 = scalar_lea.vmem %s365_s24, 32 }
  0x8b   : > { %p1821_p7 = scmp.ne.s32.totalorder %s365_s24, %s1820_s14  ;;  %p1828_p13 = scmp.lt.s32.totalorder %s365_s24, %s365_s24 }
  0x8c   : > { %p1829_p1 = scmp.lt.s32.totalorder %s1827_s28, %s1820_s14 }
  0x8d   : > { %p1823_p8 = pnand %p1821_p7, %p2058_p0 }
  0x8e   : > { %p1830_p6 = por %p1829_p1, %p1828_p13 }
  0x8f   : > { %p1824_p11 = pneg %p1823_p8 }
  0x91   : > { %p1831_p9 = pnand %p1830_p6, %p1824_p11 }
  0x93   : > { %1834 = shalt.err (!%p1831_p9)
}
  0x94   : > { %1552 = dma.hbm_to_vmem [thread:$0]  (!%p2042_p12), %s2329_s8, 16, %s365_s24, [#allocation10]  }
  0x95   : > { %p2359_p5 = scmp.ne.s32.totalorder %s2354_s29, 0 }
  0x96   : > { %p2360_p10 = scmp.eq.s32.totalorder (!%p2359_p5), %s2004_s21, 0 }
  0x97   : > { %391 = sbr.rel (%p2359_p5) target bundleno = 1336 (0x538), region = 64 }
  0x9e   : > { %1880 = dma.done.wait (%p2360_p10), [#allocation4], 4096   ;;  %p2361_p0 = pmov %p2360_p10 }
  0xa0   : > { %1882 = vsyncadd (%p2361_p0), [#allocation4], 4294963200  ;;  %p2362_p2 = pmov %p2361_p0 }
  0xa1   : > { %p2363_p3 = pmov %p2361_p0 }
  0xa2   : > { %1884 = dma.done.wait (%p2362_p2), [#allocation7], 2064  }
  0xa3   : > { %1886 = vsyncadd (%p2363_p3), [#allocation7], 4294965232  ;;  %p2364_p4 = pmov %p2361_p0 }
  0xa4   : > { %p2365_p12 = pmov %p2361_p0 }
  0xa5   : > { %1888 = dma.done.wait (%p2364_p4), [#allocation10], 32  }
  0xa6   : > { %1890 = vsyncadd (%p2365_p12), [#allocation10], 4294967264  ;;  %v1920_v0 = vmov 0.0   ;;  %v1611_v1 = vld [vmem:[#allocation3 + $0x4] ss:$8 sps:$4 sm:$0xff]   ;;  %p447_p7 = scmp.lt.s32.totalorder %s2004_s21, 1  ;;  %v497_v54 = vlaneseq }
  0xa7   : > { %453 = vst [vmem:[#allocation2 + $0x8] sm:$0xff] %v1920_v0  ;;  %v1613_v2 = vld [vmem:[#allocation3] ss:$8 sps:$4 sm:$0xff]   ;;  %667 = vmatprep.subr.bf16.mxu0 %v1611_v1  ;;  %v1614_v3 = vld [vmem:[#allocation3 + $0x14] ss:$8 sps:$4 sm:$0xff]   ;;  %vm457_vm0 = vcmask 31744  }
  0xa8   : > { %668 = vmatpush1.bf16.msra.mxu0 %v1613_v2  ;;  %v1616_v4 = vld [vmem:[#allocation3 + $0x10] ss:$8 sps:$4 sm:$0xff]   ;;  %v1617_v5 = vld [vmem:[#allocation3 + $0x24] ss:$8 sps:$4 sm:$0xff]   ;;  %v1619_v6 = vld [vmem:[#allocation3 + $0x20] ss:$8 sps:$4 sm:$0xff]  }
  0xa9   : > { %669 = vmatprep.subr.bf16.mxu0 %v1614_v3  ;;  %v1620_v7 = vld [vmem:[#allocation3 + $0x34] ss:$8 sps:$4 sm:$0xff]   ;;  %v1622_v8 = vld [vmem:[#allocation3 + $0x30] ss:$8 sps:$4 sm:$0xff]   ;;  %s448_s23 = scalar_select %p447_p7, %s2004_s21, 1  ;;  %v1659_v18 = vld [vmem:[#allocation6 + $0x40] sm:$0xff]  }
  0xaa   : > { %v1623_v9 = vld [vmem:[#allocation3 + $0x44] ss:$8 sps:$4 sm:$0xff]   ;;  %v1625_v10 = vld [vmem:[#allocation3 + $0x40] ss:$8 sps:$4 sm:$0xff]   ;;  %v1626_v11 = vld [vmem:[#allocation3 + $0x54] ss:$8 sps:$4 sm:$0xff]   ;;  %1418 = vmatprep.subr.bf16.mxu1 %v1659_v18 }
  0xab   : > { %s1417_s29 = sshll.u32 %s448_s23, 4  ;;  %v1628_v12 = vld [vmem:[#allocation3 + $0x50] ss:$8 sps:$4 sm:$0xff]   ;;  %v1629_v13 = vld [vmem:[#allocation3 + $0x64] ss:$8 sps:$4 sm:$0xff]   ;;  %v498_v55 = vshrl.u32 %v497_v54, 7 }
  0xac   : > { %670 = vmatpush1.bf16.msra.mxu0 %v1616_v4  ;;  %s451_s22 = scalar_lea.vmem %s2321_s0, %s1417_s29  ;;  %v1631_v14 = vld [vmem:[#allocation3 + $0x60] ss:$8 sps:$4 sm:$0xff]   ;;  %v1632_v17 = vld [vmem:[#allocation3 + $0x74] ss:$8 sps:$4 sm:$0xff]   ;;  %v1634_v21 = vld [vmem:[#allocation3 + $0x70] ss:$8 sps:$4 sm:$0xff]  }
  0xad   : > { %671 = vmatprep.subr.bf16.mxu0 %v1617_v5  ;;  %v455_v15 = vld [vmem:[%s451_s22 + $0x8] sm:$0xff]  ;;  %v2178_v16 = vld [vmem:[%s451_s22] sm:$0xff]  ;;  %v1660_v19 = vld [vmem:[#allocation6] sm:$0xff]   ;;  %v499_v56 = vsub.s32 0, %v498_v55  ;;  %v503_v58 = vsub.s32 1, %v498_v55  ;;  %vm1921_vm1 = vmmov 0  }
  0xae   : > { %458 = vst.msk [vmem:[#allocation2 + $0x8] sm:$0xff] %vm457_vm0, %v455_v15  ;;  %v1661_v20 = vld [vmem:[#allocation6 + $0x48] sm:$0xff]   ;;  %1419 = vmatpush3.bf16.msra.mxu1 %v1660_v19  ;;  %v1663_v23 = vld [vmem:[#allocation6 + $0x50] sm:$0xff]   ;;  %v1665_v28 = vld [vmem:[#allocation6 + $0x58] sm:$0xff]   ;;  %v461_v49 = vpack.c.bf16 %v2178_v16, %v2178_v16  ;;  %vm1154_vm2 = vcmask 523264   ;;  %s444_s6 = sand.u32 1, %s1901_s18  }
  0xaf   : > { %v1662_v22 = vld [vmem:[#allocation6 + $0x8] sm:$0xff]   ;;  %1420 = vmatprep.subr.bf16.mxu1 %v1661_v20  ;;  %v1664_v25 = vld [vmem:[#allocation6 + $0x10] sm:$0xff]   ;;  %v1666_v32 = vld [vmem:[#allocation6 + $0x18] sm:$0xff]   ;;  %s1337_s11 = sshll.u32 %s444_s6, 3  ;;  %s1414_s25 = sshll.u32 %s2004_s21, 7  ;;  %vm1198_vm3 = vcmask 326656  }
  0xb0   : > { %672 = vmatpush1.bf16.msra.mxu0 %v1619_v6  ;;  %v1635_v24 = vld [vmem:[#allocation3 + $0x84] ss:$8 sps:$4 sm:$0xff]   ;;  %v1637_v29 = vld [vmem:[#allocation3 + $0x80] ss:$8 sps:$4 sm:$0xff]   ;;  %v1638_v30 = vld [vmem:[#allocation3 + $0x94] ss:$8 sps:$4 sm:$0xff]  }
  0xb1   : > { %673 = vmatprep.subr.bf16.mxu0 %v1620_v7  ;;  %v1640_v31 = vld [vmem:[#allocation3 + $0x90] ss:$8 sps:$4 sm:$0xff]   ;;  %v1641_v33 = vld [vmem:[#allocation3 + $0xa4] ss:$8 sps:$4 sm:$0xff]   ;;  %v1643_v37 = vld [vmem:[#allocation3 + $0xa0] ss:$8 sps:$4 sm:$0xff]  }
  0xb2   : > { %1421 = vmatpush3.bf16.msra.mxu1 %v1662_v22  ;;  %v1667_v34 = vld [vmem:[#allocation6 + $0x60] sm:$0xff]   ;;  %v1669_v36 = vld [vmem:[#allocation6 + $0x68] sm:$0xff]   ;;  %v1644_v38 = vld [vmem:[#allocation3 + $0xb4] ss:$8 sps:$4 sm:$0xff]   ;;  %s446_s30 = scalar_lea.vmem [#allocation12], %s1337_s11  ;;  %s2366_s19 = sld [smem:[#allocation25_spill]] }
  0xb3   : > { %1422 = vmatprep.subr.bf16.mxu1 %v1663_v23  ;;  %v1668_v35 = vld [vmem:[#allocation6 + $0x20] sm:$0xff]   ;;  %v1670_v39 = vld [vmem:[#allocation6 + $0x28] sm:$0xff]   ;;  %v1646_v40 = vld [vmem:[#allocation3 + $0xb0] ss:$8 sps:$4 sm:$0xff]   ;;  %s1214_s14 = sshll.u32 %s446_s30, 4  ;;  %s1201_s21 = scalar_lea.sflag [#allocation5], %s444_s6  ;;  %s2281_s14 = int_to_ptr.vmem [resolvable:$true] %s1214_s14 }
  0xb4   : > { %674 = vmatpush1.bf16.msra.mxu0 %v1622_v8  ;;  %v1647_v41 = vld [vmem:[#allocation3 + $0xc4] ss:$8 sps:$4 sm:$0xff]   ;;  %v1649_v42 = vld [vmem:[#allocation3 + $0xc0] ss:$8 sps:$4 sm:$0xff]   ;;  %v1650_v43 = vld [vmem:[#allocation3 + $0xd4] ss:$8 sps:$4 sm:$0xff]  }
  0xb5   : > { %675 = vmatprep.subr.bf16.mxu0 %v1623_v9  ;;  %v460_v26 = vld [vmem:[#allocation2 + $0x8] sm:$0xff]  ;;  %v1653_v45 = vld [vmem:[#allocation3 + $0xe4] ss:$8 sps:$4 sm:$0xff]   ;;  %v1655_v46 = vld [vmem:[#allocation3 + $0xe0] ss:$8 sps:$4 sm:$0xff]   ;;  %s1835_s13 = scalar_lea.vmem %s2281_s14, 128 }
  0xb6   : > { %v462_v27 = vpack.c.bf16 %v460_v26, %v460_v26  ;;  %1423 = vmatpush3.bf16.msra.mxu1 %v1664_v25  ;;  %v1652_v44 = vld [vmem:[#allocation3 + $0xd0] ss:$8 sps:$4 sm:$0xff]   ;;  %v1656_v47 = vld [vmem:[#allocation3 + $0xf4] ss:$8 sps:$4 sm:$0xff]   ;;  %v1682_v15 = vld [vmem:[%s2326_s5 + $0x38] sm:$0xff]   ;;  %p1836_p8 = scmp.ne.s32.totalorder %s2281_s14, %s1835_s13  ;;  %p2368_p11 = scmp.ne.s32.totalorder %s2351_s27, 0 }
  0xb7   : > { %1424 = vmatprep.subr.bf16.mxu1 %v1665_v28  ;;  %v1658_v48 = vld [vmem:[#allocation3 + $0xf0] ss:$8 sps:$4 sm:$0xff]   ;;  %v1685_v18 = vld [vmem:[%s2328_s7 + $0x10] sm:$0xff]   ;;  %v1686_v19 = vld [vmem:[%s2328_s7 + $0x18] sm:$0xff]   ;;  %s1922_s24 = smov [#allocation12]  }
  0xb8   : > { %676 = vmatpush1.bf16.msra.mxu0 %v1625_v10  ;;  %699 = vmatprep.mubr.bf16.mxu0 %v462_v27  ;;  %v1671_v50 = vld [vmem:[#allocation6 + $0x70] sm:$0xff]   ;;  %v1673_v52 = vld [vmem:[#allocation6 + $0x78] sm:$0xff]   ;;  %v1677_v10 = vld [vmem:[%s2326_s5 + $0x10] sm:$0xff]   ;;  %s2367_s23 = smov %s2366_s19  ;;  %s2279_s29 = scalar_lea.hbm %s2366_s19, %s1414_s25 }
  0xb9   : > { %677 = vmatprep.subr.bf16.mxu0 %v1626_v11  ;;  %v1672_v51 = vld [vmem:[#allocation6 + $0x30] sm:$0xff]   ;;  %v1674_v53 = vld [vmem:[#allocation6 + $0x38] sm:$0xff]   ;;  %v1678_v11 = vld [vmem:[%s2326_s5 + $0x18] sm:$0xff]   ;;  %p1837_p13 = pnand %p1836_p8, %p2368_p11  ;;  %s1839_s22 = sshll.u32 %s1922_s24, 4  ;;  %s1840_s22 = int_to_ptr.vmem [resolvable:$false] %s1839_s22 }
  0xba   : > { %1425 = vmatpush3.bf16.msra.mxu1 %v1666_v32  ;;  %v495_v57 = vld [vmem:[%s2323_s2] sm:$0x3]  ;;  %v1676_v9 = vld [vmem:[%s2326_s5 + $0x8] sm:$0xff]   ;;  %v1372_v23 = vld [vmem:[#allocation8] ss:$0 sm:$0xff]  ;;  %s1841_s15 = scalar_lea.vmem %s1840_s22, 256  ;;  %p1842_p6 = scmp.lt.s32.totalorder %s2281_s14, %s1840_s22 }
  0xbb   : > { %1426 = vmatprep.subr.bf16.mxu1 %v1667_v34  ;;  %v500_v59 = vrot.slane %v495_v57, %v499_v56  ;;  %v504_v60 = vrot.slane %v495_v57, %v503_v58  ;;  %v1675_v7 = vld [vmem:[%s2326_s5] sm:$0xff]   ;;  %v1690_v32 = vld [vmem:[%s2328_s7 + $0x38] sm:$0xff]   ;;  %v1692_v34 = vld [vmem:[%s2330_s9 + $0x8] sm:$0xff]   ;;  %p1838_p1 = pneg %p1837_p13  ;;  %p1843_p9 = scmp.lt.s32.totalorder %s1841_s15, %s1835_s13 }
  0xbc   : > { %678 = vmatpush1.bf16.msra.mxu0 %v1628_v12  ;;  %v1679_v12 = vld [vmem:[%s2326_s5 + $0x20] sm:$0xff]  }
  0xbd   : > { %679 = vmatprep.subr.bf16.mxu0 %v1629_v13  ;;  %v1680_v13 = vld [vmem:[%s2326_s5 + $0x28] sm:$0xff]   ;;  %v1683_v16 = vld [vmem:[%s2328_s7] sm:$0xff]   ;;  %p1844_p5 = por %p1843_p9, %p1842_p6 }
  0xbe   : > { %1427 = vmatpush3.bf16.msra.mxu1 %v1668_v35  ;;  %v1687_v20 = vld [vmem:[%s2328_s7 + $0x20] sm:$0xff]   ;;  %v1389_v35 = vld [vmem:[#allocation9] ss:$0 sm:$0xff] }
  0xbf   : > { %1428 = vmatprep.subr.bf16.mxu1 %v1669_v36  ;;  %p1845_p10 = pnand %p1844_p5, %p1838_p1 }
  0xc0   : > { %680 = vmatpush1.bf16.msra.mxu0 %v1631_v14  ;;  %v1681_v14 = vld [vmem:[%s2326_s5 + $0x30] sm:$0xff]  }
  0xc1   : > { %681 = vmatprep.subr.bf16.mxu0 %v1632_v17  ;;  %v1684_v17 = vld [vmem:[%s2328_s7 + $0x8] sm:$0xff]  }
  0xc2   : > { %1429 = vmatpush3.bf16.msra.mxu1 %v1670_v39 }
  0xc3   : > { %1430 = vmatprep.subr.bf16.mxu1 %v1671_v50 }
  0xc4   : > { %682 = vmatpush1.bf16.msra.mxu0 %v1634_v21  ;;  %v1688_v21 = vld [vmem:[%s2328_s7 + $0x28] sm:$0xff]  }
  0xc5   : > { %683 = vmatprep.subr.bf16.mxu0 %v1635_v24 }
  0xc6   : > { %1431 = vmatpush3.bf16.msra.mxu1 %v1672_v51 }
  0xc7   : > { %1432 = vmatprep.subr.bf16.mxu1 %v1673_v52 }
  0xc8   : > { %684 = vmatpush1.bf16.msra.mxu0 %v1637_v29 }
  0xc9   : > { %685 = vmatprep.subr.bf16.mxu0 %v1638_v30 }
  0xca   : > { %1433 = vmatpush3.bf16.msra.mxu1 %v1674_v53 }
  0xcb   : > { %1463 = vmatprep.subr.bf16.mxu1 %v1920_v0 }
  0xcc   : > { %686 = vmatpush1.bf16.msra.mxu0 %v1640_v31  ;;  %v1689_v31 = vld [vmem:[%s2328_s7 + $0x30] sm:$0xff]  }
  0xcd   : > { %687 = vmatprep.subr.bf16.mxu0 %v1641_v33  ;;  %v1691_v33 = vld [vmem:[%s2330_s9] sm:$0xff]  }
  0xd0   : > { %688 = vmatpush1.bf16.msra.mxu0 %v1643_v37 }
  0xd1   : > { %689 = vmatprep.subr.bf16.mxu0 %v1644_v38 }
  0xd4   : > { %690 = vmatpush1.bf16.msra.mxu0 %v1646_v40 }
  0xd5   : > { %691 = vmatprep.subr.bf16.mxu0 %v1647_v41 }
  0xd8   : > { %692 = vmatpush1.bf16.msra.mxu0 %v1649_v42 }
  0xd9   : > { %693 = vmatprep.subr.bf16.mxu0 %v1650_v43  ;;  %v1693_v43 = vld [vmem:[%s2330_s9 + $0x10] sm:$0xff]  }
  0xdc   : > { %694 = vmatpush1.bf16.msra.mxu0 %v1652_v44  ;;  %v1694_v44 = vld [vmem:[%s2330_s9 + $0x18] sm:$0xff]  }
  0xdd   : > { %695 = vmatprep.subr.bf16.mxu0 %v1653_v45  ;;  %v1398_v45 = vld [vmem:[#allocation11] ss:$0 sm:$0xff] }
  0xe0   : > { %696 = vmatpush1.bf16.msra.mxu0 %v1655_v46 }
  0xe1   : > { %697 = vmatprep.subr.bf16.mxu0 %v1656_v47 }
  0xe4   : > { %698 = vmatpush1.bf16.msra.mxu0 %v1658_v48 }
  0xe5   : > { %1483 = vmatprep.subr.bf16.mxu0 %v1920_v0 }
  0xe7   : > { %700 = vmatmul.mubr.bf16.vlgmr.msra.gmra.mrb[0].mxu0 %v461_v49 }
  0xe8   : > { %1499 = vmatprep.mubr.msk.bf16.mxu0 %vm1921_vm1, %v1920_v0  ;;  %1484 = vmatpush3.bf16.msra.mxu0 %v1683_v16 }
  0xe9   : > { %1485 = vmatprep.subr.bf16.mxu0 %v1920_v0 }
  0xec   : > { %1486 = vmatpush3.bf16.msra.mxu0 %v1684_v17 }
  0xed   : > { %1487 = vmatprep.subr.bf16.mxu0 %v1920_v0 }
  0xf0   : > { %1488 = vmatpush3.bf16.msra.mxu0 %v1685_v18 }
  0xf1   : > { %1489 = vmatprep.subr.bf16.mxu0 %v1920_v0 }
  0xf4   : > { %1490 = vmatpush3.bf16.msra.mxu0 %v1686_v19 }
  0xf5   : > { %1491 = vmatprep.subr.bf16.mxu0 %v1920_v0 }
  0xf8   : > { %1492 = vmatpush3.bf16.msra.mxu0 %v1687_v20 }
  0xf9   : > { %1493 = vmatprep.subr.bf16.mxu0 %v1920_v0 }
  0xfc   : > { %1494 = vmatpush3.bf16.msra.mxu0 %v1688_v21 }
  0xfd   : > { %1495 = vmatprep.subr.bf16.mxu0 %v1920_v0 }
 0x100   : > { %1496 = vmatpush3.bf16.msra.mxu0 %v1689_v31 }
 0x101   : > { %1497 = vmatprep.subr.bf16.mxu0 %v1920_v0 }
 0x104   : > { %1498 = vmatpush3.bf16.msra.mxu0 %v1690_v32 }
 0x1ba   : > { %v701_v61 = vpop.f32.mrb[0].mxu0 }
 0x1bb   : > { %v702_v62 = vadd.f32 %v701_v61, %v500_v59  ;;  %v703_v63 = vpop.f32.mrb[1].mxu0 }
 0x1bc   : > { %v704_v1 = vadd.f32 %v703_v63, %v504_v60  ;;  %v705_v2 = vpop.f32.mrb[2].mxu0 }
 0x1bd   : > { %v708_v3 = vmax.f32 %v702_v62, 0.0  ;;  %v706_v4 = vpop.f32.mrb[3].mxu0 }
 0x1be   : > { %v709_v5 = vmax.f32 %v704_v1, 0.0 }
 0x1bf   : > { %v710_v8 = vpack.c.bf16 %v708_v3, %v708_v3 }
 0x1c0   : > { %v711_v6 = vpack.c.bf16 %v709_v5, %v709_v5 }
 0x1c2   : > { %879 = vmatprep.mubr.bf16.mxu1 %v711_v6 }
 0x1c3   : > { %880 = vmatmul.mubr.bf16.vlgmr.msra.gmra.mrb[0].mxu1 %v710_v8 }
 0x1c4   : > { %1464 = vmatpush3.bf16.msra.mxu1 %v1675_v7  ;;  %1479 = vmatprep.mubr.msk.bf16.mxu1 %vm1921_vm1, %v1920_v0 }
 0x1c5   : > { %1465 = vmatprep.subr.bf16.mxu1 %v1920_v0 }
 0x1c8   : > { %1466 = vmatpush3.bf16.msra.mxu1 %v1676_v9 }
 0x1c9   : > { %1467 = vmatprep.subr.bf16.mxu1 %v1920_v0 }
 0x1cc   : > { %1468 = vmatpush3.bf16.msra.mxu1 %v1677_v10 }
 0x1cd   : > { %1469 = vmatprep.subr.bf16.mxu1 %v1920_v0 }
 0x1d0   : > { %1470 = vmatpush3.bf16.msra.mxu1 %v1678_v11 }
 0x1d1   : > { %1471 = vmatprep.subr.bf16.mxu1 %v1920_v0 }
 0x1d4   : > { %1472 = vmatpush3.bf16.msra.mxu1 %v1679_v12 }
 0x1d5   : > { %1473 = vmatprep.subr.bf16.mxu1 %v1920_v0 }
 0x1d8   : > { %1474 = vmatpush3.bf16.msra.mxu1 %v1680_v13 }
 0x1d9   : > { %1475 = vmatprep.subr.bf16.mxu1 %v1920_v0 }
 0x1dc   : > { %1476 = vmatpush3.bf16.msra.mxu1 %v1681_v14 }
 0x1dd   : > { %1477 = vmatprep.subr.bf16.mxu1 %v1920_v0 }
 0x1e0   : > { %1478 = vmatpush3.bf16.msra.mxu1 %v1682_v15 }
 0x1e1   : > { %1503 = vmatprep.subr.bf16.mxu1 %v1920_v0 }
 0x296   : > { %v1434_v22 = vpop.f32.mrb[0].mxu1 }
 0x297   : > { %v1435_v24 = vpop.f32.mrb[1].mxu1 }
 0x298   : > { %v1436_v25 = vadd.f32 %v1435_v24, %v1434_v22  ;;  %v1437_v26 = vpop.f32.mrb[2].mxu1 }
 0x299   : > { %v1438_v27 = vpop.f32.mrb[3].mxu1 }
 0x29a   : > { %v882_v28 = vadd.f32 %v1436_v25, %v1372_v23 }
 0x29c   : > { %v887_v29 = vmax.f32 %v882_v28, 0.0 }
 0x29e   : > { %v888_v30 = vpack.c.bf16 %v887_v29, %v887_v29 }
 0x2a0   : > { %1480 = vmatmul.mubr.bf16.vlgmr.msra.gmra.mrb[4].mxu1 %v888_v30 }
 0x2a1   : > { %1511 = vmatprep.mubr.msk.bf16.mxu1 %vm1921_vm1, %v1920_v0  ;;  %1504 = vmatpush3.bf16.msra.mxu1 %v1691_v33 }
 0x2a2   : > { %1505 = vmatprep.subr.bf16.mxu1 %v1920_v0 }
 0x2a5   : > { %1506 = vmatpush3.bf16.msra.mxu1 %v1692_v34 }
 0x2a6   : > { %1507 = vmatprep.subr.bf16.mxu1 %v1920_v0 }
 0x2a9   : > { %1508 = vmatpush3.bf16.msra.mxu1 %v1693_v43 }
 0x2aa   : > { %1509 = vmatprep.subr.bf16.mxu1 %v1920_v0  ;;  %v1407_v0 = vld [vmem:[%s2331_s10] ss:$0 sm:$0xff] }
 0x2ad   : > { %1510 = vmatpush3.bf16.msra.mxu1 %v1694_v44 }
 0x373   : > { %v994_v36 = vpop.f32.mrb[4].mxu1 }
 0x374   : > { %v995_v37 = vadd.f32 %v1389_v35, %v994_v36  ;;  %v1481_v38 = vpop.f32.mrb[5].mxu1 }
 0x375   : > { %v997_v39 = vpop.f32.mrb[6].mxu1 }
 0x376   : > { %v1000_v40 = vmax.f32 %v995_v37, 0.0  ;;  %v1482_v41 = vpop.f32.mrb[7].mxu1 }
 0x378   : > { %v1001_v42 = vpack.c.bf16 %v1000_v40, %v1000_v40 }
 0x37a   : > { %1500 = vmatmul.mubr.bf16.vlgmr.msra.gmra.mrb[4].mxu0 %v1001_v42 }
 0x44d   : > { %v1107_v46 = vpop.f32.mrb[4].mxu0 }
 0x44e   : > { %v1108_v47 = vadd.f32 %v1398_v45, %v1107_v46  ;;  %v1501_v48 = vpop.f32.mrb[5].mxu0 }
 0x44f   : > { %v1110_v49 = vpop.f32.mrb[6].mxu0 }
 0x450   : > { %v1113_v50 = vmax.f32 %v1108_v47, 0.0  ;;  %v1502_v51 = vpop.f32.mrb[7].mxu0 }
 0x452   : > { %v1114_v52 = vpack.c.bf16 %v1113_v50, %v1113_v50 }
 0x454   : > { %1512 = vmatmul.mubr.msk.bf16.vlgmr.msra.gmra.mrb[8].mxu1 %vm1154_vm2, %v1114_v52 }
 0x527   : > { %v1192_v53 = vpop.f32.mrb[8].mxu1 }
 0x528   : > { %v1193_v54 = vadd.f32 %v1407_v0, %v1192_v53  ;;  %v1513_v55 = vpop.f32.mrb[9].mxu1 }
 0x529   : > { %v1195_v56 = vpop.f32.mrb[10].mxu1 }
 0x52a   : > { %v1514_v57 = vpop.f32.mrb[11].mxu1  ;;  %1199 = vst.msk [vmem:[%s446_s30] sm:$0xff] %vm1198_vm3, %v1193_v54 }
 0x52b   : > { %1848 = shalt.err (!%p1845_p10)
}
 0x52c   : > { %s1849_s12 = scalar_lea.hbm %s2279_s29, 128  ;;  %s1853_s6 = scalar_lea.hbm %s2367_s23, 256 }
 0x52d   : > { %p1850_p0 = scmp.ne.s32.totalorder %s2279_s29, %s1849_s12  ;;  %p1854_p4 = scmp.lt.u32.totalorder %s2279_s29, %s2367_s23 }
 0x52e   : > { %p1855_p12 = scmp.lt.u32.totalorder %s1853_s6, %s1849_s12  ;;  %p1857_p8 = scmp.lt.u32.totalorder %s1849_s12, %s2279_s29 }
 0x52f   : > { %p1851_p2 = pnand %p1850_p0, %p2368_p11 }
 0x530   : > { %p1856_p7 = por %p1855_p12, %p1854_p4 }
 0x531   : > { %p1852_p3 = pneg %p1851_p2 }
 0x532   : > { %p1858_p13 = por %p1857_p8, %p1856_p7 }
 0x534   : > { %p1859_p1 = pnand %p1858_p13, %p1852_p3 }
 0x536   : > { %1862 = shalt.err (!%p1859_p1)
}
 0x537   : > { %1535 = dma.vmem_to_hbm [thread:$0]  (%p2368_p11), %s2281_s14, 128, %s2279_s29, %s1201_s21  }
 0x538 PF: > { %s2369_s26 = sld [smem:[#allocation19_spill]]  ;;  %s2370_s25 = sld [smem:[#allocation17_spill]] }
 0x539   : > { %s2371_s30 = sld [smem:[#allocation22_spill]] }
 0x53e   : > { %p1567_p6 = scmp.ge.s32.totalorder %s2369_s26, 2  ;;  %s1226_s28 = sand.u32 1, %s2370_s25  }
 0x53f   : > { %p2372_p9 = scmp.ne.s32.totalorder %s2371_s30, 0  ;;  %s1227_s16 = scalar_lea.sflag [#allocation5], %s1226_s28 }
 0x541   : > { %p1554_p5 = pnand %p1567_p6, %p2372_p9 }
 0x543   : > { %1892 = dma.done.wait (!%p1554_p5), %s1227_s16, 128  }
 0x544   : > { %1894 = vsyncadd (!%p1554_p5), %s1227_s16, 4294967168  ;;  %s2373_s20 = sld [smem:[#allocation20_spill]]  ;;  %s2374_s19 = sld [smem:[#allocation18_spill]] }
 0x545   : > { %s2375_s13 = sld [smem:[#allocation21_spill]]  ;;  %s2376_s17 = smov %s1901_s18 }
 0x54a   : > { %p24_p10 = scmp.ge.s32.totalorder %s2373_s20, 4   ;;  %s2377_s18 = smov %s2374_s19 }
 0x54b   : > { %s2378_s19 = smov %s2375_s13 }
 0x54c   :  { %26 = sbr.rel (!%p24_p10) target bundleno = 10 (0xa), region = 120 }
 0x553   :  { %1232 = vsyncpa [#allocation4], 1 }
 0x554   :  { %1234 = vsyncpa [#allocation4 + $0x1], 1 }
 0x555   :  { %1235 = vsyncpa [#allocation7], 1 }
 0x556   :  { %1236 = vsyncpa [#allocation10], 1 }
 0x557   :  { %1237 = vsyncpa [#allocation5], 1 }
 0x558   :  { %1239 = vsyncpa [#allocation5 + $0x1], 1 }

</bundles_post_ra>
